<compile_context>
chip_gen: v5e
topology: v5e:2x2
jax: 0.10.0
libtpu: 0.0.40
codegen_flags: <defaults>
</compile_context>

<pallas_src>
from functools import partial

import jax
import jax.numpy as jnp
from jax.experimental import pallas as pl
from jax.experimental.pallas import tpu as pltpu


# ----------------------------------------------------------------------------
# Small helpers
# ----------------------------------------------------------------------------

def _round_up(v, m):
    return (v + m - 1) // m * m


def _bspec(shape, index_map, *, single_buffer=False):
    """BlockSpec, optionally single-buffered (for blocks that never change)."""
    if single_buffer and hasattr(pl, "Buffered"):
        try:
            return pl.BlockSpec(shape, index_map, pipeline_mode=pl.Buffered(1))
        except Exception:  # older/newer API without pipeline_mode -> default buffering
            pass
    return pl.BlockSpec(shape, index_map)


def _pick_tcout(Kpad, Cpad):
    """Output-channel tile: lane-dense (mult. of 128), weight block <= ~4 MiB."""
    t = min(Cpad, 512)
    while t > 128 and (Cpad % t != 0 or 8 * Kpad * t > (4 << 20)):
        t -= 128
    return t


def _vmem_limit_bytes(Min, Kpad, GS, tcout):
    x_b = Min * Kpad * 2            # bf16 input slab
    w_b = 4 * Kpad * tcout * 2      # bf16 weight taps
    y_b = GS * tcout * 2            # bf16 output tile
    acc_b = GS * tcout * 4          # f32 accumulator (values)
    total = 2 * (x_b + w_b + y_b) + acc_b + GS * 4 + 2 * tcout * 8
    return int(min(96 << 20, max(16 << 20, total + (8 << 20))))


# ----------------------------------------------------------------------------
# Pallas kernels: 4-tap (2x2 over s2d) conv with fused LeakyReLU or BN statistics
# ----------------------------------------------------------------------------

def _conv_taps_leaky_kernel(x_ref, w_ref, y_ref, *, shifts, m_rows):
    """Four shifted (m, K) x (K, C) MXU dots, f32 accumulate, LeakyReLU(0.2), bf16 out."""
    acc = jnp.dot(x_ref[pl.ds(shifts[0], m_rows), :], w_ref[0],
                  preferred_element_type=jnp.float32)
    for t in range(1, 4):
        acc = acc + jnp.dot(x_ref[pl.ds(shifts[t], m_rows), :], w_ref[t],
                            preferred_element_type=jnp.float32)
    y_ref[...] = jnp.where(acc >= 0.0, acc, 0.2 * acc).astype(y_ref.dtype)


def _conv_taps_stats_kernel(x_ref, w_ref, mask_ref, y_ref, s_ref, q_ref, *,
                            shifts, m_rows):
    """Same conv, raw (pre-BN) bf16 output + masked per-channel sum / sum-of-squares."""
    acc = jnp.dot(x_ref[pl.ds(shifts[0], m_rows), :], w_ref[0],
                  preferred_element_type=jnp.float32)
    for t in range(1, 4):
        acc = acc + jnp.dot(x_ref[pl.ds(shifts[t], m_rows), :], w_ref[t],
                            preferred_element_type=jnp.float32)
    y_ref[...] = acc.astype(y_ref.dtype)
    m = mask_ref[...]                       # (m_rows, 1) f32: 1 on real output pixels
    ym = acc * m
    s_ref[...] = jnp.sum(ym, axis=0, keepdims=True)
    q_ref[...] = jnp.sum(ym * acc, axis=0, keepdims=True)


# ----------------------------------------------------------------------------
# pallas_call wrapper
# ----------------------------------------------------------------------------

def _conv_pallas(x_groups, w_taps, g, *, mask=None, norm):
    num_groups, Min, Kpad = x_groups.shape
    Cpad = w_taps.shape[-1]
    GS = g["G"] * g["S"]
    assert Kpad == g["Kpad"] and w_taps.shape[1] == Kpad
    assert Min == GS + g["Epad"]

    tcout = _pick_tcout(Kpad, Cpad)
    n_cout = Cpad // tcout
    shifts = (0, 1, g["OWe"], g["OWe"] + 1)
    grid = (num_groups, n_cout)

    x_spec = pl.BlockSpec((None, Min, Kpad), lambda i, j: (i, 0, 0))
    w_spec = _bspec((4, Kpad, tcout), lambda i, j: (0, 0, j),
                    single_buffer=(n_cout == 1))
    y_spec = pl.BlockSpec((None, GS, tcout), lambda i, j: (i, 0, j))
    cparams = pltpu.CompilerParams(
        dimension_semantics=("parallel", "parallel"),
        vmem_limit_bytes=_vmem_limit_bytes(Min, Kpad, GS, tcout))

    if norm:
        kern = partial(_conv_taps_stats_kernel, shifts=shifts, m_rows=GS)
        mask_spec = _bspec((GS, 1), lambda i, j: (0, 0), single_buffer=True)
        stat_spec = pl.BlockSpec((None, 1, tcout), lambda i, j: (i, 0, j))
        return pl.pallas_call(
            kern,
            out_shape=(jax.ShapeDtypeStruct((num_groups, GS, Cpad), jnp.bfloat16),
                       jax.ShapeDtypeStruct((num_groups, 1, Cpad), jnp.float32),
                       jax.ShapeDtypeStruct((num_groups, 1, Cpad), jnp.float32)),
            grid=grid,
            in_specs=[x_spec, w_spec, mask_spec],
            out_specs=(y_spec, stat_spec, stat_spec),
            compiler_params=cparams,
        )(x_groups, w_taps, mask)

    kern = partial(_conv_taps_leaky_kernel, shifts=shifts, m_rows=GS)
    return pl.pallas_call(
        kern,
        out_shape=jax.ShapeDtypeStruct((num_groups, GS, Cpad), jnp.bfloat16),
        grid=grid,
        in_specs=[x_spec, w_spec],
        out_specs=y_spec,
        compiler_params=cparams,
    )(x_groups, w_taps)


# ----------------------------------------------------------------------------
# Layout plumbing (pure reshapes/pads; ~1x activation bytes, fused by XLA)
# ----------------------------------------------------------------------------

def _geometry(N, H, W, Cin, target_rows=512):
    assert H % 2 == 0 and W % 2 == 0, "4x4/s2/p1 conv needs even spatial dims"
    OH, OW = H // 2, W // 2
    OHe, OWe = OH + 1, OW + 1
    Me = OHe * OWe                       # rows of the s2d slab per image
    Mout = OH * OWe                      # output rows computed per image (incl. ow==OW garbage)
    S = _round_up(Me + 1, 16)            # per-image slab stride (input & output)
    Epad = _round_up(OWe + 2, 16)        # group tail pad so tap reads stay in-bounds
    Kpad = _round_up(4 * Cin, 128)       # lane-dense contraction dim
    G = max(1, min(max(1, target_rows // S), max(1, N // 2)))  # >=2 groups when N>=2
    num_groups = -(-N // G)
    return dict(OH=OH, OW=OW, OHe=OHe, OWe=OWe, Me=Me, Mout=Mout, S=S, Epad=Epad,
                Kpad=Kpad, G=G, num_groups=num_groups, Npad=num_groups * G)


def _prep_input(a, g):
    """(N,H,W,Cin) -> (num_groups, G*S + Epad, Kpad) bf16 s2d-flattened slabs."""
    N, H, W, Cin = a.shape
    xp = jnp.pad(a, ((0, 0), (1, 1), (1, 1), (0, 0)))
    y = xp.reshape(N, g["OHe"], 2, g["OWe"], 2, Cin)
    y = jnp.transpose(y, (0, 1, 3, 2, 4, 5)).reshape(N, g["Me"], 4 * Cin)
    y = jnp.pad(y, ((0, g["Npad"] - N), (0, g["S"] - g["Me"]), (0, g["Kpad"] - 4 * Cin)))
    y = y.reshape(g["num_groups"], g["G"] * g["S"], g["Kpad"])
    y = jnp.pad(y, ((0, 0), (0, g["Epad"]), (0, 0)))
    return y.astype(jnp.bfloat16)


def _make_mask(g):
    """(G*S, 1) f32: 1.0 on rows that correspond to real output pixels."""
    r = jnp.arange(g["S"], dtype=jnp.int32)
    valid = (r < g["Mout"]) & ((r % g["OWe"]) < g["OW"])
    slot = valid.astype(jnp.float32)
    return jnp.tile(slot, g["G"]).reshape(g["G"] * g["S"], 1)


def _extract(y_ext, g, N, cout):
    """(num_groups, G*S, Cpad) -> (N, OH, OW, cout)."""
    Cpad = y_ext.shape[-1]
    y = y_ext.reshape(g["Npad"], g["S"], Cpad)[:N, :g["Mout"], :cout]
    return y.reshape(N, g["OH"], g["OWe"], cout)[:, :, :g["OW"], :]


def _prep_weight_taps(w, kpad, cpad):
    """torch (Cout,Cin,4,4) -> (4 taps, kpad, cpad) bf16 matching the s2d/tap ordering."""
    Cout, Cin, KH, KW = w.shape
    assert KH == 4 and KW == 4
    wt = jnp.transpose(w, (2, 3, 1, 0)).reshape(2, 2, 2, 2, Cin, Cout)   # (a,u,b,v,c,o)
    wt = jnp.transpose(wt, (0, 2, 1, 3, 4, 5)).reshape(4, 4 * Cin, Cout)  # (t=(a,b), k=(u,v,c), o)
    wt = jnp.pad(wt, ((0, 0), (0, kpad - 4 * Cin), (0, cpad - Cout)))
    return wt.astype(jnp.bfloat16)


def merge_first_layer_weights(w_x, w_y):
    """Block-diagonal weight: one conv == cat(conv_x1(X), conv_y1(label), dim=channel)."""
    co_x, cin_x, kh, kw = w_x.shape
    co_y, cin_y, _, _ = w_y.shape
    w = jnp.zeros((co_x + co_y, cin_x + cin_y, kh, kw), jnp.float32)
    w = w.at[:co_x, :cin_x].set(w_x)
    w = w.at[co_x:, cin_x:].set(w_y)
    return w


# ----------------------------------------------------------------------------
# Discriminator layers / forward
# ----------------------------------------------------------------------------

def _conv_layer(a, w_taps, *, cout, norm):
    """4x4/s2/p1 conv [+ BN(batch stats)] + LeakyReLU(0.2) on an NHWC activation."""
    N, H, W, Cin = a.shape
    g = _geometry(N, H, W, Cin)
    xg = _prep_input(a, g)

    if norm:
        y_ext, s, q = _conv_pallas(xg, w_taps, g, mask=_make_mask(g), norm=True)
        y = _extract(y_ext, g, N, cout).astype(jnp.float32)
        count = jnp.float32(N * g["OH"] * g["OW"])
        s_tot = jnp.sum(s, axis=(0, 1))[:cout]
        q_tot = jnp.sum(q, axis=(0, 1))[:cout]
        mean = s_tot / count
        var = jnp.maximum(q_tot / count - mean * mean, 0.0)    # biased var, clamped
        scale = jax.lax.rsqrt(var + 1e-5)                      # gamma = 1
        shift = -mean * scale                                  # beta  = 0
        # BN affine + LeakyReLU: fused by XLA into the (unavoidable) next-layer layout copy.
        y = y * scale + shift
        y = jnp.where(y >= 0, y, 0.2 * y)
    else:
        y_ext = _conv_pallas(xg, w_taps, g, norm=False)        # LeakyReLU fused in-kernel
        y = _extract(y_ext, g, N, cout).astype(jnp.float32)
    return y.astype(jnp.bfloat16)


def discriminator_fwd(cfg, prep, X_nchw, label_nchw):
    x = jnp.transpose(X_nchw, (0, 2, 3, 1))
    lab = jnp.transpose(label_nchw, (0, 2, 3, 1))
    a = jnp.concatenate([x, lab], axis=-1)                     # (N, H, W, C+10)

    # conv_x1 + conv_y1 + channel concat == one block-diagonal conv (exact equivalence)
    a = _conv_layer(a, prep["w1"], cout=cfg["c1"], norm=False)
    a = _conv_layer(a, prep["w2"], cout=cfg["c2"], norm=True)
    a = _conv_layer(a, prep["w3"], cout=cfg["c3"], norm=True)

    # conv_4: 4x4 valid conv -> 1 channel -> Sigmoid.  Plain XLA GEMV per the perf review
    # (padding Cout 1 -> 128 in Pallas would waste 127/128 of the MXU for a tiny op).
    N, H4, W4, _ = a.shape
    assert H4 == 4 and W4 == 4, "conv_4 expects a 4x4 spatial map (use 32x32 inputs)"
    logits = a.reshape(N, -1).astype(jnp.float32) @ prep["w4"] + prep["b4"][0]
    return jax.nn.sigmoid(logits).reshape(N, 1, 1, 1)          # NCHW (N,1,1,1)


def prepare_discriminator(params, input_ch, base_width):
    """One-time weight preprocessing (hoisted out of the per-step jitted forward)."""
    bw = base_width

    def taps(w):
        cout, cin = int(w.shape[0]), int(w.shape[1])
        return _prep_weight_taps(w, _round_up(4 * cin, 128), _round_up(cout, 128))

    w1 = merge_first_layer_weights(params["w_x1"], params["w_y1"])
    prep = {
        "w1": taps(w1),
        "w2": taps(params["w2"]),
        "w3": taps(params["w3"]),
        "w4": jnp.transpose(params["w4"], (2, 3, 1, 0)).reshape(-1).astype(jnp.float32),
        "b4": params["b4"].astype(jnp.float32),
    }
    cfg = {"c1": bw, "c2": 2 * bw, "c3": 4 * bw}
    return cfg, prep


# ----------------------------------------------------------------------------
# Pure-JAX f32 reference (for a correctness check only)
# ----------------------------------------------------------------------------

def _reference_forward(params, X, label):
    def conv(x, w, stride, pad):
        return jax.lax.conv_general_dilated(
            x, w, (stride, stride), [(pad, pad), (pad, pad)],
            dimension_numbers=("NCHW", "OIHW", "NCHW"))

    def leaky(x):
        return jnp.where(x >= 0, x, 0.2 * x)

    def bn(x):
        mean = x.mean(axis=(0, 2, 3), keepdims=True)
        var = x.var(axis=(0, 2, 3), keepdims=True)
        return (x - mean) * jax.lax.rsqrt(var + 1e-5)

    h = jnp.concatenate([conv(X, params["w_x1"], 2, 1),
                         conv(label, params["w_y1"], 2, 1)], axis=1)
    h = leaky(h)
    h = leaky(bn(conv(h, params["w2"], 2, 1)))
    h = leaky(bn(conv(h, params["w3"], 2, 1)))
    h = conv(h, params["w4"], 1, 0) + params["b4"].reshape(1, 1, 1, 1)
    return jax.nn.sigmoid(h)


# ----------------------------------------------------------------------------
# Parameter construction (deterministic, synthetic)
# ----------------------------------------------------------------------------

def init_params(key, input_ch, base_width):
    bw = base_width
    ks = jax.random.split(key, 6)

    def conv_w(k, cout, cin):
        return (0.05 * jax.random.normal(k, (cout, cin, 4, 4))).astype(jnp.float32)

    return {
        "w_x1": conv_w(ks[0], bw // 2, input_ch),
        "w_y1": conv_w(ks[1], bw // 2, 10),
        "w2":   conv_w(ks[2], bw * 2, bw),
        "w3":   conv_w(ks[3], bw * 4, bw * 2),
        "w4":   conv_w(ks[4], 1, bw * 4),
        "b4":   (0.05 * jax.random.normal(ks[5], (1,))).astype(jnp.float32),
    }


# ----------------------------------------------------------------------------
# Main
# ----------------------------------------------------------------------------

if __name__ == "__main__":
    N, C, H, W = 2, 4, 32, 32          # 32x32 so the final 4x4 valid conv yields 1x1
    base_width = 16                    # scaled-down stand-in for the default 128

    key = jax.random.PRNGKey(0)
    kx, klab, kparam, ktest = jax.random.split(key, 4)

    X = jax.random.normal(kx, (N, C, H, W), dtype=jnp.float32)          # NCHW, like torch
    classes = jnp.array([3, 7], dtype=jnp.int32)
    label = jnp.broadcast_to(
        jax.nn.one_hot(classes, 10, dtype=jnp.float32)[:, :, None, None],
        (N, 10, H, W),
    )
    params = init_params(kparam, C, base_width)

    # ---- single conv-block check vs lax.conv (validates the s2d/tap decomposition) ----
    a_t = jax.random.normal(ktest, (2, 8, 8, 12), dtype=jnp.float32)
    w_t = (0.05 * jax.random.normal(jax.random.fold_in(ktest, 1), (16, 12, 4, 4))
           ).astype(jnp.float32)
    wt_taps = _prep_weight_taps(w_t, _round_up(4 * 12, 128), _round_up(16, 128))
    got = jax.jit(lambda a_, w_: _conv_layer(a_, w_, cout=16, norm=False))(a_t, wt_taps)
    ref = jax.lax.conv_general_dilated(
        jnp.transpose(a_t, (0, 3, 1, 2)), w_t, (2, 2), [(1, 1), (1, 1)],
        dimension_numbers=("NCHW", "OIHW", "NCHW"))
    ref = jnp.transpose(jnp.where(ref >= 0, ref, 0.2 * ref), (0, 2, 3, 1))
    blk_err = float(jnp.max(jnp.abs(got.astype(jnp.float32) - ref)))
    assert blk_err < 3e-2, f"conv block mismatch vs lax.conv: {blk_err}"

    # ---- full discriminator forward ----
    cfg, prep = prepare_discriminator(params, input_ch=C, base_width=base_width)
    fwd = jax.jit(partial(discriminator_fwd, cfg))
    out = jax.block_until_ready(fwd(prep, X, label))

    assert out.shape == (N, 1, 1, 1), out.shape
    assert bool(jnp.all(jnp.isfinite(out)))
    assert bool(jnp.all((out >= 0.0) & (out <= 1.0)))

    ref_out = jax.jit(_reference_forward)(params, X, label)
    full_err = float(jnp.max(jnp.abs(out - ref_out)))
    assert full_err < 8e-2, f"forward mismatch vs f32 reference: {full_err}"

    print("KERNEL_OK")
</pallas_src>

<mosaic_0001>
module attributes {stable_mosaic.version = 11 : i64} {
  func.func @_conv_taps_leaky_kernel(%arg0: i32, %arg1: i32, %arg2: memref<1x48x128xbf16, #tpu.memory_space<vmem>>, %arg3: memref<4x128x128xbf16, #tpu.memory_space<vmem>>, %arg4: memref<1x32x128xbf16, #tpu.memory_space<vmem>>) attributes {dimension_semantics = [#tpu.dimension_semantics<parallel>, #tpu.dimension_semantics<parallel>], iteration_bounds = array<i64: 2, 1>, scalar_prefetch = 0 : i64, scratch_operands = 0 : i64, tpu.core_type = #tpu.core_type<tc>, window_params = [{transform_indices = @transform_0, window_bounds = array<i64: 1, 48, 128>}, {pipeline_mode = #tpu.pipeline_mode<synchronous>, transform_indices = @transform_1, window_bounds = array<i64: 4, 128, 128>}, {transform_indices = @transform_2, window_bounds = array<i64: 1, 32, 128>}]} {
    %c0 = arith.constant 0 : index
    %c0_0 = arith.constant 0 : index
    %c0_1 = arith.constant 0 : index
    %0 = vector.load %arg2[%c0, %c0_0, %c0_1] : memref<1x48x128xbf16, #tpu.memory_space<vmem>>, vector<1x32x128xbf16>
    %1 = vector.shape_cast %0 : vector<1x32x128xbf16> to vector<32x128xbf16>
    %c0_2 = arith.constant 0 : index
    %c0_3 = arith.constant 0 : index
    %c0_4 = arith.constant 0 : index
    %2 = vector.load %arg3[%c0_2, %c0_3, %c0_4] : memref<4x128x128xbf16, #tpu.memory_space<vmem>>, vector<1x128x128xbf16>
    %3 = vector.shape_cast %2 : vector<1x128x128xbf16> to vector<128x128xbf16>
    %cst = arith.constant dense<0.000000e+00> : vector<32x128xf32>
    %4 = tpu.matmul %1, %3, %cst {dimension_numbers = #tpu.dot_dimension_numbers<[1], [0], [0], [1], [0, 0, 1, 1], [], []>} : vector<32x128xbf16>, vector<128x128xbf16>, vector<32x128xf32> -> vector<32x128xf32>
    %c0_5 = arith.constant 0 : index
    %c1 = arith.constant 1 : index
    %c0_6 = arith.constant 0 : index
    %5 = vector.load %arg2[%c0_5, %c1, %c0_6] : memref<1x48x128xbf16, #tpu.memory_space<vmem>>, vector<1x32x128xbf16>
    %6 = vector.shape_cast %5 : vector<1x32x128xbf16> to vector<32x128xbf16>
    %c1_7 = arith.constant 1 : index
    %c0_8 = arith.constant 0 : index
    %c0_9 = arith.constant 0 : index
    %7 = vector.load %arg3[%c1_7, %c0_8, %c0_9] : memref<4x128x128xbf16, #tpu.memory_space<vmem>>, vector<1x128x128xbf16>
    %8 = vector.shape_cast %7 : vector<1x128x128xbf16> to vector<128x128xbf16>
    %cst_10 = arith.constant dense<0.000000e+00> : vector<32x128xf32>
    %9 = tpu.matmul %6, %8, %cst_10 {dimension_numbers = #tpu.dot_dimension_numbers<[1], [0], [0], [1], [0, 0, 1, 1], [], []>} : vector<32x128xbf16>, vector<128x128xbf16>, vector<32x128xf32> -> vector<32x128xf32>
    %10 = arith.addf %4, %9 : vector<32x128xf32>
    %c0_11 = arith.constant 0 : index
    %c5 = arith.constant 5 : index
    %c0_12 = arith.constant 0 : index
    %11 = vector.load %arg2[%c0_11, %c5, %c0_12] : memref<1x48x128xbf16, #tpu.memory_space<vmem>>, vector<1x32x128xbf16>
    %12 = vector.shape_cast %11 : vector<1x32x128xbf16> to vector<32x128xbf16>
    %c2 = arith.constant 2 : index
    %c0_13 = arith.constant 0 : index
    %c0_14 = arith.constant 0 : index
    %13 = vector.load %arg3[%c2, %c0_13, %c0_14] : memref<4x128x128xbf16, #tpu.memory_space<vmem>>, vector<1x128x128xbf16>
    %14 = vector.shape_cast %13 : vector<1x128x128xbf16> to vector<128x128xbf16>
    %cst_15 = arith.constant dense<0.000000e+00> : vector<32x128xf32>
    %15 = tpu.matmul %12, %14, %cst_15 {dimension_numbers = #tpu.dot_dimension_numbers<[1], [0], [0], [1], [0, 0, 1, 1], [], []>} : vector<32x128xbf16>, vector<128x128xbf16>, vector<32x128xf32> -> vector<32x128xf32>
    %16 = arith.addf %10, %15 : vector<32x128xf32>
    %c0_16 = arith.constant 0 : index
    %c6 = arith.constant 6 : index
    %c0_17 = arith.constant 0 : index
    %17 = vector.load %arg2[%c0_16, %c6, %c0_17] : memref<1x48x128xbf16, #tpu.memory_space<vmem>>, vector<1x32x128xbf16>
    %18 = vector.shape_cast %17 : vector<1x32x128xbf16> to vector<32x128xbf16>
    %c3 = arith.constant 3 : index
    %c0_18 = arith.constant 0 : index
    %c0_19 = arith.constant 0 : index
    %19 = vector.load %arg3[%c3, %c0_18, %c0_19] : memref<4x128x128xbf16, #tpu.memory_space<vmem>>, vector<1x128x128xbf16>
    %20 = vector.shape_cast %19 : vector<1x128x128xbf16> to vector<128x128xbf16>
    %cst_20 = arith.constant dense<0.000000e+00> : vector<32x128xf32>
    %21 = tpu.matmul %18, %20, %cst_20 {dimension_numbers = #tpu.dot_dimension_numbers<[1], [0], [0], [1], [0, 0, 1, 1], [], []>} : vector<32x128xbf16>, vector<128x128xbf16>, vector<32x128xf32> -> vector<32x128xf32>
    %22 = arith.addf %16, %21 : vector<32x128xf32>
    %cst_21 = arith.constant 0.000000e+00 : f32
    %23 = vector.broadcast %cst_21 : f32 to vector<32x128xf32>
    %24 = arith.cmpf oge, %22, %23 : vector<32x128xf32>
    %cst_22 = arith.constant 2.000000e-01 : f32
    %25 = vector.broadcast %cst_22 : f32 to vector<32x128xf32>
    %26 = arith.mulf %25, %22 : vector<32x128xf32>
    %27 = arith.select %24, %22, %26 : vector<32x128xi1>, vector<32x128xf32>
    %28 = arith.truncf %27 : vector<32x128xf32> to vector<32x128xbf16>
    %c0_23 = arith.constant 0 : index
    %c0_24 = arith.constant 0 : index
    %c0_25 = arith.constant 0 : index
    %29 = vector.load %arg4[%c0_23, %c0_24, %c0_25] : memref<1x32x128xbf16, #tpu.memory_space<vmem>>, vector<1x32x128xbf16>
    %30 = vector.shape_cast %29 : vector<1x32x128xbf16> to vector<32x128xbf16>
    %31 = vector.shape_cast %28 : vector<32x128xbf16> to vector<1x32x128xbf16>
    tpu.vector_store %arg4[%c0_23, %c0_24, %c0_25], %31 {strides = array<i32>} : memref<1x32x128xbf16, #tpu.memory_space<vmem>>, vector<1x32x128xbf16>,
    return
  }
  func.func @transform_0(%arg0: i32, %arg1: i32) -> (i32, i32, i32) {
    %c0_i32 = arith.constant 0 : i32
    %c0_i32_0 = arith.constant 0 : i32
    %c0_i32_1 = arith.constant 0 : i32
    return %arg0, %c0_i32, %c0_i32_0 : i32, i32, i32
  }
  func.func @transform_1(%arg0: i32, %arg1: i32) -> (i32, i32, i32) {
    %c0_i32 = arith.constant 0 : i32
    %c0_i32_0 = arith.constant 0 : i32
    %c0_i32_1 = arith.constant 0 : i32
    return %c0_i32, %c0_i32_0, %arg1 : i32, i32, i32
  }
  func.func @transform_2(%arg0: i32, %arg1: i32) -> (i32, i32, i32) {
    %c0_i32 = arith.constant 0 : i32
    %c0_i32_0 = arith.constant 0 : i32
    return %arg0, %c0_i32, %arg1 : i32, i32, i32
  }
}

</mosaic_0001>

<bundles_post_ra>
// kernel: _lambda_.1
= control target key start
LH: loop header
LB: loop body
LE: loop exit
PB: predicated region body
PF: predicated region fallthrough
CT: control target
= control target key end

     0   :  { %s1028_s9 = smov 0   ;;  %s1030_s10 = smov 0   ;;  %s1191_s0 = inlined_call_operand.vmem [shape: bf16[2,48,128], index: 0, kind: input, shape index: {}]   ;;  %s1192_s1 = inlined_call_operand.vmem [shape: bf16[4,128,128], index: 1, kind: input, shape index: {}]   ;;  %s1193_s2 = inlined_call_operand.vmem [shape: bf16[2,32,128], index: 2, kind: output, shape index: {}]  }
   0x1   :  { %s1032_s11 = smov 0  }
   0x2 LB: > { %s24_s12 = sadd.s32 1, %s1007_s10  ;;  %p729_p0 = scmp.ge.s32.totalorder %s1011_s11, 1  ;;  %s1011_s11 = sphi %s1032_s11, %s12_s11   ;;  %s1007_s10 = sphi %s1030_s10, %s1195_s10   ;;  %s1003_s9 = sphi %s1028_s9, %s1194_s9  }
   0x3   : > { %p26_p1 = scmp.ge.s32.totalorder %s24_s12, 2  ;;  %p135_p2 = scmp.lt.s32.totalorder %s1011_s11, 3 }
   0x5   : > { %s1197_s12 = smov (%p26_p1, %s24_s12), 0  ;;  %p136_p3 = pnand %p729_p0, %p135_p2 }
   0x6   : > { %p164_p4 = scmp.lt.s32.totalorder (!%p136_p3), %s1003_s9, 1 }
   0x7   : > { %139 = sbr.rel (%p136_p3) target bundleno = 212 (0xd4), region = 28 }
   0xc   : > { %v932_v0 = vld [vmem:[%s1192_s1 + $0x78] sm:$0xff]  ;;  %v931_v4 = vld [vmem:[%s1192_s1 + $0x70] sm:$0xff]  ;;  %s1199_s9 = smov (!%p164_p4, %s1003_s9), 1  ;;  %v930_v8 = vld [vmem:[%s1192_s1 + $0x68] sm:$0xff]  ;;  %vm232_vm0 = vsmask.f32 7424 }
   0xd   : > { %v924_v1 = vld [vmem:[%s1192_s1 + $0x38] sm:$0xff]  ;;  %303 = vmatpush.bf16.msra.mxu0 %v932_v0  ;;  %v923_v5 = vld [vmem:[%s1192_s1 + $0x30] sm:$0xff]  ;;  %s964_s29 = smul.u32 24, %s1199_s9  ;;  %v922_v9 = vld [vmem:[%s1192_s1 + $0x28] sm:$0xff]  ;;  %vm416_vm1 = vsmask.f32 5376 }
   0xe   : > { %v940_v2 = vld [vmem:[%s1192_s1 + $0xb8] sm:$0xff]  ;;  %372 = vmatpush.bf16.msra.mxu1 %v924_v1  ;;  %v939_v6 = vld [vmem:[%s1192_s1 + $0xb0] sm:$0xff]  ;;  %v938_v10 = vld [vmem:[%s1192_s1 + $0xa8] sm:$0xff]  ;;  %vm532_vm2 = vcmask 1044480  }
   0xf   : > { %v948_v3 = vld [vmem:[%s1192_s1 + $0xf8] sm:$0xff]  ;;  %488 = vmatpush.bf16.msra.mxu2 %v940_v2  ;;  %v947_v7 = vld [vmem:[%s1192_s1 + $0xf0] sm:$0xff]  ;;  %v946_v11 = vld [vmem:[%s1192_s1 + $0xe8] sm:$0xff]  ;;  %s1088_s16 = scalar_lea.vmem %s1191_s0, %s964_s29 }
  0x10   : > { %588 = vmatpush.bf16.msra.mxu3 %v948_v3  ;;  %v929_v12 = vld [vmem:[%s1192_s1 + $0x60] sm:$0xff]  ;;  %v928_v20 = vld [vmem:[%s1192_s1 + $0x58] sm:$0xff]  ;;  %v1114_v22 = vld [vmem:[%s1088_s16 + $0x8] sm:$0xff] }
  0x11   : > { %304 = vmatpush.bf16.msra.mxu0 %v931_v4  ;;  %v921_v13 = vld [vmem:[%s1192_s1 + $0x20] sm:$0xff]  ;;  %v920_v21 = vld [vmem:[%s1192_s1 + $0x18] sm:$0xff]  ;;  %v927_v27 = vld [vmem:[%s1192_s1 + $0x50] sm:$0xff]  ;;  %v245_v30 = vshrl.u32 %v1114_v22, 16  ;;  %v241_v33 = vshll.u32 %v1114_v22, 16  ;;  %v534_v53 = vrot.slane %v1114_v22, 3 }
  0x12   : > { %373 = vmatpush.bf16.msra.mxu1 %v923_v5  ;;  %v1097_v14 = vld [vmem:[%s1088_s16] sm:$0xff]   ;;  %v936_v23 = vld [vmem:[%s1192_s1 + $0x98] sm:$0xff]  ;;  %v919_v28 = vld [vmem:[%s1192_s1 + $0x10] sm:$0xff] }
  0x13   : > { %489 = vmatpush.bf16.msra.mxu2 %v939_v6  ;;  %v937_v15 = vld [vmem:[%s1192_s1 + $0xa0] sm:$0xff]  ;;  %v952_v17 = vunpack.c.h.b16 %v1097_v14  ;;  %v944_v24 = vld [vmem:[%s1192_s1 + $0xd8] sm:$0xff]  ;;  %v236_v29 = vshll.u32 %v1097_v14, 16  ;;  %v935_v31 = vld [vmem:[%s1192_s1 + $0x90] sm:$0xff]  ;;  %v234_v39 = vshrl.u32 %v1097_v14, 16  ;;  %v425_v41 = vrot.slane %v245_v30, 2 }
  0x14   : > { %589 = vmatpush.bf16.msra.mxu3 %v947_v7  ;;  %v945_v16 = vld [vmem:[%s1192_s1 + $0xe0] sm:$0xff]  ;;  %v943_v32 = vld [vmem:[%s1192_s1 + $0xd0] sm:$0xff]  ;;  %v926_v37 = vld [vmem:[%s1192_s1 + $0x48] sm:$0xff]  ;;  %v426_v46 = vrot.slane %v241_v33, 3  ;;  %v243_v52 = vrot.slane %v241_v33, 1 }
  0x15   : > { %305 = vmatpush.bf16.msra.mxu0 %v930_v8  ;;  %v391_v18 = vld [vmem:[%s1088_s16] sm:$0xc]  ;;  %v918_v38 = vld [vmem:[%s1192_s1 + $0x8] sm:$0xff]  ;;  %v238_v40 = vrot.slane %v236_v29, 1  ;;  %v392_v48 = vld [vmem:[%s1088_s16 + $0x10] sm:$0x7] }
  0x16   : > { %374 = vmatpush.bf16.msra.mxu1 %v922_v9  ;;  %v412_v19 = vunpack.c.l.b16 %v391_v18  ;;  %v511_v26 = vld [vmem:[%s1088_s16] sm:$0x8]  ;;  %v934_v42 = vld [vmem:[%s1192_s1 + $0x88] sm:$0xff]  ;;  %v427_v57 = vor.u32 %v426_v46, %v425_v41  ;;  %v201_v59 = vld [vmem:[%s1088_s16 + $0x10] sm:$0x1]  ;;  %v413_v60 = vunpack.c.l.b16 %v392_v48  ;;  %v247_v8 = vor.u32 %v245_v30, %v243_v52  ;;  %s915_s16 = sshll.u32 %s1199_s9, 4 }
  0x17   : > { %490 = vmatpush.bf16.msra.mxu2 %v938_v10  ;;  %v530_v36 = vunpack.c.l.b16 %v511_v26  ;;  %v942_v43 = vld [vmem:[%s1192_s1 + $0xc8] sm:$0xff]  ;;  %v925_v49 = vld [vmem:[%s1192_s1 + $0x40] sm:$0xff]  ;;  %v239_v51 = vor.u32 %v238_v40, %v234_v39  ;;  %v228_v62 = vunpack.c.l.b16 %v201_v59  ;;  %s180_s8 = scalar_lea.vmem %s1193_s2, %s915_s16 }
  0x18   : > { %590 = vmatpush.bf16.msra.mxu3 %v946_v11  ;;  %v414_v25 = vpack.c.b16 %v952_v17, %v412_v19  ;;  %v917_v50 = vld [vmem:[%s1192_s1] sm:$0xff]  ;;  %v415_v1 = vpack.c.b16 %v413_v60, %v413_v60 }
  0x19   : > { %306 = vmatpush.bf16.msra.mxu0 %v929_v12  ;;  %v531_v47 = vpack.c.b16 %v952_v17, %v530_v36  ;;  %v933_v54 = vld [vmem:[%s1192_s1 + $0x80] sm:$0xff]  ;;  %v244_v61 = vsel %vm232_vm0, %v239_v51, %v243_v52  ;;  %v231_v2 = vpack.c.b16 %v228_v62, %v228_v62 }
  0x1a   : > { %375 = vmatpush.bf16.msra.mxu1 %v921_v13  ;;  %v418_v34 = vshrl.u32 %v414_v25, 16  ;;  %v421_v35 = vshll.u32 %v414_v25, 16  ;;  %v941_v55 = vld [vmem:[%s1192_s1 + $0xc0] sm:$0xff]  ;;  %v430_v3 = vshrl.u32 %v415_v1, 16  ;;  %v433_v4 = vshll.u32 %v415_v1, 16 }
  0x1b   : > { %491 = vmatpush.bf16.msra.mxu2 %v937_v15  ;;  %v533_v58 = vrot.slane %v531_v47, 3  ;;  %v249_v5 = vshll.u32 %v231_v2, 16  ;;  %v536_v11 = vrot.slane %v415_v1, 3 }
  0x1c   : > { %591 = vmatpush.bf16.msra.mxu3 %v945_v16  ;;  %v420_v44 = vrot.slane %v418_v34, 2  ;;  %v423_v45 = vrot.slane %v421_v35, 3  ;;  %v432_v6 = vrot.slane %v430_v3, 2  ;;  %v435_v7 = vrot.slane %v433_v4, 3 }
  0x1d   : > { %307 = vmatpush.bf16.msra.mxu0 %v928_v20  ;;  %v535_v0 = vsel %vm532_vm2, %v533_v58, %v534_v53  ;;  %v251_v9 = vrot.slane %v249_v5, 1 }
  0x1e   : > { %376 = vmatpush.bf16.msra.mxu1 %v920_v21  ;;  %v424_v56 = vor.u32 %v423_v45, %v420_v44  ;;  %v436_v10 = vor.u32 %v435_v7, %v432_v6 }
  0x1f   : > { %492 = vmatpush.bf16.msra.mxu2 %v936_v23  ;;  %v252_v12 = vsel %vm232_vm0, %v247_v8, %v251_v9 }
  0x20   : > { %592 = vmatpush.bf16.msra.mxu3 %v944_v24  ;;  %v428_v63 = vsel %vm416_vm1, %v424_v56, %v427_v57  ;;  %v437_v13 = vsel %vm416_vm1, %v427_v57, %v436_v10 }
  0x21   : > { %308 = vmatpush.bf16.msra.mxu0 %v927_v27 }
  0x22   : > { %377 = vmatpush.bf16.msra.mxu1 %v919_v28 }
  0x23   : > { %493 = vmatpush.bf16.msra.mxu2 %v935_v31 }
  0x24   : > { %593 = vmatpush.bf16.msra.mxu3 %v943_v32 }
  0x25   : > { %309 = vmatpush.bf16.msra.mxu0 %v926_v37 }
  0x26   : > { %378 = vmatpush.bf16.msra.mxu1 %v918_v38 }
  0x27   : > { %494 = vmatpush.bf16.msra.mxu2 %v934_v42 }
  0x28   : > { %594 = vmatpush.bf16.msra.mxu3 %v942_v43 }
  0x29   : > { %310 = vmatpush.bf16.msra.mxu0 %v925_v49 }
  0x2a   : > { %379 = vmatpush.bf16.msra.mxu1 %v917_v50 }
  0x2b   : > { %495 = vmatpush.bf16.msra.mxu2 %v933_v54 }
  0x2c   : > { %595 = vmatpush.bf16.msra.mxu3 %v941_v55  ;;  %311 = vmatmul.bf16.vlgmr.msra.gmra.mxu0 %v244_v61 }
  0x2d   : > { %380 = vmatmul.bf16.vlgmr.msra.gmra.mxu1 %v1097_v14  ;;  %v537_v14 = vsel %vm532_vm2, %v534_v53, %v536_v11 }
  0x2e   : > { %496 = vmatmul.bf16.vlgmr.msra.gmra.mxu2 %v428_v63 }
  0x2f   : > { %596 = vmatmul.bf16.vlgmr.msra.gmra.mxu3 %v535_v0 }
  0x3c   : > { %316 = vmatmul.bf16.gmra.mxu0 %v252_v12 }
  0x3d   : > { %385 = vmatmul.bf16.gmra.mxu1 %v1114_v22 }
  0x3e   : > { %501 = vmatmul.bf16.gmra.mxu2 %v437_v13 }
  0x3f   : > { %601 = vmatmul.bf16.gmra.mxu3 %v537_v14 }
  0xa9   : > { %v312_v15 = vpop.f32.mrf.mxu0 }
  0xaa   : > { %v381_v16 = vpop.f32.mrf.mxu1 }
  0xab   : > { %v382_v17 = vadd.f32 %v381_v16, %v312_v15 }
  0xb1   : > { %v497_v18 = vpop.f32.mrf.mxu2  ;;  %v314_v20 = vpop.f32.mrf.mxu0 }
  0xb2   : > { %v597_v19 = vpop.f32.mrf.mxu3  ;;  %v383_v21 = vpop.f32.mrf.mxu1  ;;  %v507_v23 = vadd.f32 %v497_v18, %v382_v17 }
  0xb3   : > { %v384_v25 = vadd.f32 %v383_v21, %v314_v20 }
  0xb4   : > { %v607_v24 = vadd.f32 %v597_v19, %v507_v23 }
  0xb6   : > { %v615_v31 = vmul.f32 0.2, %v607_v24  ;;  %vm611_vm3 = vcmp.ge.f32.partialorder %v607_v24, 0.0 }
  0xb8   : > { %v619_v33 = vsel %vm611_vm3, %v607_v24, %v615_v31 }
  0xb9   : > { %v499_v26 = vpop.f32.mrf.mxu2  ;;  %v317_v29 = vpop.f32.mrf.mxu0 }
  0xba   : > { %v599_v27 = vpop.f32.mrf.mxu3  ;;  %v508_v28 = vadd.f32 %v499_v26, %v384_v25  ;;  %v386_v30 = vpop.f32.mrf.mxu1 }
  0xbb   : > { %v387_v35 = vadd.f32 %v386_v30, %v317_v29 }
  0xbc   : > { %v608_v22 = vadd.f32 %v599_v27, %v508_v28 }
  0xbe   : > { %vm612_vm4 = vcmp.ge.f32.partialorder %v608_v22, 0.0  ;;  %v616_v32 = vmul.f32 0.2, %v608_v22 }
  0xc0   : > { %v620_v34 = vsel %vm612_vm4, %v608_v22, %v616_v32 }
  0xc1   : > { %v956_v36 = vpack.c.bf16 %v620_v34, %v619_v33  ;;  %v502_v37 = vpop.f32.mrf.mxu2  ;;  %v319_v40 = vpop.f32.mrf.mxu0 }
  0xc2   : > { %v602_v38 = vpop.f32.mrf.mxu3  ;;  %v509_v39 = vadd.f32 %v502_v37, %v387_v35  ;;  %v388_v41 = vpop.f32.mrf.mxu1 }
  0xc3   : > { %957 = vst [vmem:[%s180_s8] sm:$0xff] %v956_v36   ;;  %v389_v43 = vadd.f32 %v388_v41, %v319_v40 }
  0xc4   : > { %v609_v42 = vadd.f32 %v602_v38, %v509_v39 }
  0xc6   : > { %v617_v47 = vmul.f32 0.2, %v609_v42  ;;  %vm613_vm5 = vcmp.ge.f32.partialorder %v609_v42, 0.0 }
  0xc8   : > { %v621_v50 = vsel %vm613_vm5, %v609_v42, %v617_v47 }
  0xc9   : > { %v504_v44 = vpop.f32.mrf.mxu2 }
  0xca   : > { %v510_v45 = vadd.f32 %v504_v44, %v389_v43  ;;  %v604_v46 = vpop.f32.mrf.mxu3 }
  0xcc   : > { %v610_v48 = vadd.f32 %v604_v46, %v510_v45 }
  0xce   : > { %vm614_vm6 = vcmp.ge.f32.partialorder %v610_v48, 0.0  ;;  %v618_v49 = vmul.f32 0.2, %v610_v48 }
  0xd0   : > { %v622_v51 = vsel %vm614_vm6, %v610_v48, %v618_v49 }
  0xd1   : > { %v961_v52 = vpack.c.bf16 %v622_v51, %v621_v50 }
  0xd3   : > { %963 = vst [vmem:[%s180_s8 + $0x8] sm:$0xff] %v961_v52  }
  0xd4 PF: > { %s12_s11 = sadd.s32 1, %s1011_s11   ;;  %s1194_s9 = smov %s1007_s10 }
  0xd5   : > { %p9_p5 = scmp.ge.s32.totalorder %s12_s11, 4   ;;  %s1195_s10 = smov %s1197_s12 }
  0xd7   :  { %11 = sbr.rel (!%p9_p5) target bundleno = 2 (0x2), region = 64 }

</bundles_post_ra>
